<compile_context>
chip_gen: v7x
topology: tpu7x:2x2x1
jax: 0.10.0
libtpu: 0.0.40
codegen_flags: <defaults>
</compile_context>

<pallas_src>
import functools

import jax
import jax.numpy as jnp
from jax.experimental import pallas as pl
from jax.experimental.pallas import tpu as pltpu


def _mlp_kernel(x_ref, w1_ref, b1_ref, w2_ref, b2_ref, w3_ref, b3_ref, o_ref):
    # Feed the MXU bf16 operands; accumulate in f32.  Bias add + tanh in f32.
    x = x_ref[...].astype(jnp.bfloat16)                                  # (TB, in_dim)

    h1 = jnp.dot(x, w1_ref[...], preferred_element_type=jnp.float32) + b1_ref[...]
    h1 = jnp.tanh(h1).astype(jnp.bfloat16)                               # (TB, hidden)

    h2 = jnp.dot(h1, w2_ref[...], preferred_element_type=jnp.float32) + b2_ref[...]
    h2 = jnp.tanh(h2).astype(jnp.bfloat16)                               # (TB, hidden)

    o_ref[...] = (
        jnp.dot(h2, w3_ref[...], preferred_element_type=jnp.float32) + b3_ref[...]
    )                                                                    # (TB, out_dim) f32


def _round_up(n, m):
    return ((n + m - 1) // m) * m


@functools.partial(jax.jit, static_argnames=("block_batch",))
def mlp_forward(x, params, *, block_batch=1024):
    """Fused MLP forward. x: (batch, in_dim) float32. Returns (batch, out_dim) f32."""
    w1, b1, w2, b2, w3, b3 = params
    batch, in_dim = x.shape
    hidden = w1.shape[1]
    out_dim = w3.shape[1]

    # Weights go to the MXU in bf16 (cast once, outside the kernel body).
    w1b = w1.astype(jnp.bfloat16)
    w2b = w2.astype(jnp.bfloat16)
    w3b = w3.astype(jnp.bfloat16)

    # Batch tile: power-of-two bucketed, capped at block_batch, multiple of 8.
    tb = min(block_batch, max(8, pl.next_power_of_2(batch)))
    padded = _round_up(batch, tb)
    if padded != batch:
        x = jnp.pad(x, ((0, padded - batch), (0, 0)))
    grid = (pl.cdiv(padded, tb),)

    def _resident(shape):
        # Constant index_map -> block never changes -> operand stays in VMEM.
        return pl.BlockSpec(shape, lambda i: (0, 0))

    out = pl.pallas_call(
        _mlp_kernel,
        out_shape=jax.ShapeDtypeStruct((padded, out_dim), jnp.float32),
        grid=grid,
        in_specs=[
            pl.BlockSpec((tb, in_dim), lambda i: (i, 0)),   # activation stream
            _resident((in_dim, hidden)),                    # w1 (bf16)
            _resident((1, hidden)),                         # b1 (f32)
            _resident((hidden, hidden)),                    # w2 (bf16)
            _resident((1, hidden)),                         # b2 (f32)
            _resident((hidden, out_dim)),                   # w3 (bf16)
            _resident((1, out_dim)),                        # b3 (f32)
        ],
        out_specs=pl.BlockSpec((tb, out_dim), lambda i: (i, 0)),
        compiler_params=pltpu.CompilerParams(
            dimension_semantics=("parallel",),              # shard batch tiles over v7x's 2 TCs
        ),
    )(x, w1b, b1, w2b, b2, w3b, b3)

    return out[:batch]
    # TODO(synk): PPO's value head (a second 3-layer 64-wide MLP) could share the
    # x tile in this same kernel for further launch-overhead amortization.


def init_params(key, in_dim, out_dim, hidden_nn=64):
    """torch.nn.Linear-style init: U(-1/sqrt(fan_in), 1/sqrt(fan_in)).

    Weights stored as (fan_in, fan_out) — transpose of PyTorch's layout — so
    the kernel does x @ W directly.  Biases stored as (1, fan_out).
    """
    keys = jax.random.split(key, 6)

    def _layer(kw, kb, fan_in, fan_out):
        bound = 1.0 / jnp.sqrt(jnp.float32(fan_in))
        w = jax.random.uniform(kw, (fan_in, fan_out), jnp.float32, -bound, bound)
        b = jax.random.uniform(kb, (1, fan_out), jnp.float32, -bound, bound)
        return w, b

    w1, b1 = _layer(keys[0], keys[1], in_dim, hidden_nn)
    w2, b2 = _layer(keys[2], keys[3], hidden_nn, hidden_nn)
    w3, b3 = _layer(keys[4], keys[5], hidden_nn, out_dim)
    return (w1, b1, w2, b2, w3, b3)


def reference_forward(x, params, mxu_dtype=jnp.float32):
    """Plain-JAX reference (same math as the PyTorch nn.Sequential).

    mxu_dtype=jnp.bfloat16 mirrors the kernel's bf16-operand / f32-accumulate
    matmuls for a tight numerical comparison.
    """
    w1, b1, w2, b2, w3, b3 = params

    def dot(a, w):
        return jnp.dot(a.astype(mxu_dtype), w.astype(mxu_dtype),
                       preferred_element_type=jnp.float32)

    h1 = jnp.tanh(dot(x, w1) + b1)
    h2 = jnp.tanh(dot(h1, w2) + b2)
    return dot(h2, w3) + b3


if __name__ == "__main__":
    key = jax.random.PRNGKey(0)
    k_param, k_obs = jax.random.split(key)

    batch, in_dim, out_dim, hidden = 8, 16, 4, 64

    params = init_params(k_param, in_dim, out_dim, hidden_nn=hidden)
    obs = jax.random.normal(k_obs, (batch, in_dim), dtype=jnp.float32)

    out = mlp_forward(obs, params)
    out = jax.block_until_ready(out)
    assert out.shape == (batch, out_dim)

    # Tight check against a reference that uses the same bf16-operand matmuls.
    ref_bf16 = reference_forward(obs, params, mxu_dtype=jnp.bfloat16)
    assert jnp.allclose(out, ref_bf16, atol=2e-3, rtol=2e-3), "mismatch vs bf16 reference"

    # Looser sanity check against the full-f32 reference (bf16 rounding only).
    ref_f32 = reference_forward(obs, params, mxu_dtype=jnp.float32)
    assert jnp.allclose(out, ref_f32, atol=5e-2, rtol=5e-2), "mismatch vs f32 reference"

    print("KERNEL_OK")
</pallas_src>

<mosaic_0001>
module attributes {stable_mosaic.version = 11 : i64} {
  func.func @_mlp_kernel(%arg0: i32, %arg1: memref<8x16xf32, #tpu.memory_space<vmem>>, %arg2: memref<16x64xbf16, #tpu.memory_space<vmem>>, %arg3: memref<1x64xf32, #tpu.memory_space<vmem>>, %arg4: memref<64x64xbf16, #tpu.memory_space<vmem>>, %arg5: memref<1x64xf32, #tpu.memory_space<vmem>>, %arg6: memref<64x4xbf16, #tpu.memory_space<vmem>>, %arg7: memref<1x4xf32, #tpu.memory_space<vmem>>, %arg8: memref<8x4xf32, #tpu.memory_space<vmem>>) attributes {dimension_semantics = [#tpu.dimension_semantics<parallel>], iteration_bounds = array<i64: 1>, scalar_prefetch = 0 : i64, scratch_operands = 0 : i64, tpu.core_type = #tpu.core_type<tc>, window_params = [{transform_indices = @transform_0, window_bounds = array<i64: 8, 16>}, {pipeline_mode = #tpu.pipeline_mode<synchronous>, transform_indices = @transform_1, window_bounds = array<i64: 16, 64>}, {pipeline_mode = #tpu.pipeline_mode<synchronous>, transform_indices = @transform_2, window_bounds = array<i64: 1, 64>}, {pipeline_mode = #tpu.pipeline_mode<synchronous>, transform_indices = @transform_3, window_bounds = array<i64: 64, 64>}, {pipeline_mode = #tpu.pipeline_mode<synchronous>, transform_indices = @transform_4, window_bounds = array<i64: 1, 64>}, {pipeline_mode = #tpu.pipeline_mode<synchronous>, transform_indices = @transform_5, window_bounds = array<i64: 64, 4>}, {pipeline_mode = #tpu.pipeline_mode<synchronous>, transform_indices = @transform_6, window_bounds = array<i64: 1, 4>}, {transform_indices = @transform_7, window_bounds = array<i64: 8, 4>}]} {
    %c0 = arith.constant 0 : index
    %c0_0 = arith.constant 0 : index
    %0 = vector.load %arg1[%c0, %c0_0] : memref<8x16xf32, #tpu.memory_space<vmem>>, vector<8x16xf32>
    %1 = arith.truncf %0 : vector<8x16xf32> to vector<8x16xbf16>
    %c0_1 = arith.constant 0 : index
    %c0_2 = arith.constant 0 : index
    %2 = vector.load %arg2[%c0_1, %c0_2] : memref<16x64xbf16, #tpu.memory_space<vmem>>, vector<16x64xbf16>
    %cst = arith.constant dense<0.000000e+00> : vector<8x64xf32>
    %3 = tpu.matmul %1, %2, %cst {dimension_numbers = #tpu.dot_dimension_numbers<[1], [0], [0], [1], [0, 0, 1, 1], [], []>} : vector<8x16xbf16>, vector<16x64xbf16>, vector<8x64xf32> -> vector<8x64xf32>
    %c0_3 = arith.constant 0 : index
    %c0_4 = arith.constant 0 : index
    %4 = vector.load %arg3[%c0_3, %c0_4] : memref<1x64xf32, #tpu.memory_space<vmem>>, vector<1x64xf32>
    %5 = vector.broadcast %4 : vector<1x64xf32> to vector<8x64xf32>
    %6 = arith.addf %3, %5 : vector<8x64xf32>
    %7 = math.tanh %6 : vector<8x64xf32>
    %8 = arith.truncf %7 : vector<8x64xf32> to vector<8x64xbf16>
    %c0_5 = arith.constant 0 : index
    %c0_6 = arith.constant 0 : index
    %9 = vector.load %arg4[%c0_5, %c0_6] : memref<64x64xbf16, #tpu.memory_space<vmem>>, vector<64x64xbf16>
    %cst_7 = arith.constant dense<0.000000e+00> : vector<8x64xf32>
    %10 = tpu.matmul %8, %9, %cst_7 {dimension_numbers = #tpu.dot_dimension_numbers<[1], [0], [0], [1], [0, 0, 1, 1], [], []>} : vector<8x64xbf16>, vector<64x64xbf16>, vector<8x64xf32> -> vector<8x64xf32>
    %c0_8 = arith.constant 0 : index
    %c0_9 = arith.constant 0 : index
    %11 = vector.load %arg5[%c0_8, %c0_9] : memref<1x64xf32, #tpu.memory_space<vmem>>, vector<1x64xf32>
    %12 = vector.broadcast %11 : vector<1x64xf32> to vector<8x64xf32>
    %13 = arith.addf %10, %12 : vector<8x64xf32>
    %14 = math.tanh %13 : vector<8x64xf32>
    %15 = arith.truncf %14 : vector<8x64xf32> to vector<8x64xbf16>
    %c0_10 = arith.constant 0 : index
    %c0_11 = arith.constant 0 : index
    %16 = vector.load %arg6[%c0_10, %c0_11] : memref<64x4xbf16, #tpu.memory_space<vmem>>, vector<64x4xbf16>
    %cst_12 = arith.constant dense<0.000000e+00> : vector<8x4xf32>
    %17 = tpu.matmul %15, %16, %cst_12 {dimension_numbers = #tpu.dot_dimension_numbers<[1], [0], [0], [1], [0, 0, 1, 1], [], []>} : vector<8x64xbf16>, vector<64x4xbf16>, vector<8x4xf32> -> vector<8x4xf32>
    %c0_13 = arith.constant 0 : index
    %c0_14 = arith.constant 0 : index
    %18 = vector.load %arg7[%c0_13, %c0_14] : memref<1x4xf32, #tpu.memory_space<vmem>>, vector<1x4xf32>
    %19 = vector.broadcast %18 : vector<1x4xf32> to vector<8x4xf32>
    %20 = arith.addf %17, %19 : vector<8x4xf32>
    %c0_15 = arith.constant 0 : index
    %c0_16 = arith.constant 0 : index
    %21 = vector.load %arg8[%c0_15, %c0_16] : memref<8x4xf32, #tpu.memory_space<vmem>>, vector<8x4xf32>
    tpu.vector_store %arg8[%c0_15, %c0_16], %20 {strides = array<i32>} : memref<8x4xf32, #tpu.memory_space<vmem>>, vector<8x4xf32>,
    return
  }
  func.func @transform_0(%arg0: i32) -> (i32, i32) {
    %c0_i32 = arith.constant 0 : i32
    %c0_i32_0 = arith.constant 0 : i32
    return %arg0, %c0_i32 : i32, i32
  }
  func.func @transform_1(%arg0: i32) -> (i32, i32) {
    %c0_i32 = arith.constant 0 : i32
    %c0_i32_0 = arith.constant 0 : i32
    %c0_i32_1 = arith.constant 0 : i32
    return %c0_i32, %c0_i32_0 : i32, i32
  }
  func.func @transform_2(%arg0: i32) -> (i32, i32) {
    %c0_i32 = arith.constant 0 : i32
    %c0_i32_0 = arith.constant 0 : i32
    %c0_i32_1 = arith.constant 0 : i32
    return %c0_i32, %c0_i32_0 : i32, i32
  }
  func.func @transform_3(%arg0: i32) -> (i32, i32) {
    %c0_i32 = arith.constant 0 : i32
    %c0_i32_0 = arith.constant 0 : i32
    %c0_i32_1 = arith.constant 0 : i32
    return %c0_i32, %c0_i32_0 : i32, i32
  }
  func.func @transform_4(%arg0: i32) -> (i32, i32) {
    %c0_i32 = arith.constant 0 : i32
    %c0_i32_0 = arith.constant 0 : i32
    %c0_i32_1 = arith.constant 0 : i32
    return %c0_i32, %c0_i32_0 : i32, i32
  }
  func.func @transform_5(%arg0: i32) -> (i32, i32) {
    %c0_i32 = arith.constant 0 : i32
    %c0_i32_0 = arith.constant 0 : i32
    %c0_i32_1 = arith.constant 0 : i32
    return %c0_i32, %c0_i32_0 : i32, i32
  }
  func.func @transform_6(%arg0: i32) -> (i32, i32) {
    %c0_i32 = arith.constant 0 : i32
    %c0_i32_0 = arith.constant 0 : i32
    %c0_i32_1 = arith.constant 0 : i32
    return %c0_i32, %c0_i32_0 : i32, i32
  }
  func.func @transform_7(%arg0: i32) -> (i32, i32) {
    %c0_i32 = arith.constant 0 : i32
    %c0_i32_0 = arith.constant 0 : i32
    return %arg0, %c0_i32 : i32, i32
  }
}

</mosaic_0001>

<bundles_post_ra>
// kernel: mlp_forward.1
= control target key start
LH: loop header
LB: loop body
LE: loop exit
PB: predicated region body
PF: predicated region fallthrough
CT: control target
= control target key end

     0   :  { %v335_v0 = vmov 0.0   ;;  %vm336_vm0 = vmmov 0   ;;  %vm44_vm1 = vcmask 130048   ;;  %vm129_vm2 = vcmask 523264   ;;  %s421_s1 = inlined_call_operand.vmem [shape: bf16[16,64], index: 1, kind: input, shape index: {}]   ;;  %s422_s0 = inlined_call_operand.vmem [shape: f32[8,16], index: 0, kind: input, shape index: {}]   ;;  %s423_s3 = inlined_call_operand.vmem [shape: bf16[64,64], index: 3, kind: input, shape index: {}]   ;;  %s424_s2 = inlined_call_operand.vmem [shape: f32[1,64], index: 2, kind: input, shape index: {}]   ;;  %s425_s5 = inlined_call_operand.vmem [shape: bf16[64,4], index: 5, kind: input, shape index: {}]   ;;  %s426_s4 = inlined_call_operand.vmem [shape: f32[1,64], index: 4, kind: input, shape index: {}]   ;;  %s427_s6 = inlined_call_operand.vmem [shape: f32[1,4], index: 6, kind: input, shape index: {}]   ;;  %s428_s7 = inlined_call_operand.vmem [shape: f32[8,4], index: 7, kind: output, shape index: {}]  }
   0x1   :  { %290 = vmatprep.subr.bf16.mxu0 %v335_v0  ;;  %v322_v1 = vld [vmem:[%s421_s1] sm:$0xff]   ;;  %292 = vmatprep.mubr.msk.bf16.mxu0 %vm336_vm0, %v335_v0  ;;  %v324_v5 = vld [vmem:[%s423_s3 + $0x8] sm:$0xff]   ;;  %v325_v6 = vld [vmem:[%s423_s3 + $0x10] sm:$0xff]   ;;  %vm257_vm3 = vcmask 31744  }
   0x2   :  { %v27_v2 = vld [vmem:[%s422_s0] sm:$0xff]  ;;  %296 = vmatprep.subr.bf16.mxu1 %v335_v0  ;;  %304 = vmatprep.mubr.msk.bf16.mxu1 %vm336_vm0, %v335_v0  ;;  %v326_v7 = vld [vmem:[%s423_s3 + $0x18] sm:$0xff]   ;;  %v328_v17 = vld [vmem:[%s425_s5 + $0x8] sm:$0xff]  }
   0x3   :  { %291 = vmatpush3.bf16.msra.mxu0 %v322_v1  ;;  %v28_v3 = vpack.c.bf16 %v27_v2, %v27_v2  ;;  %v323_v4 = vld [vmem:[%s423_s3] sm:$0xff]   ;;  %v329_v18 = vld [vmem:[%s425_s5 + $0x10] sm:$0xff]   ;;  %v330_v19 = vld [vmem:[%s425_s5 + $0x18] sm:$0xff]  }
   0x4   :  { %308 = vmatprep.subr.bf16.mxu0 %v335_v0  ;;  %297 = vmatpush3.bf16.msra.mxu1 %v323_v4  ;;  %v263_v8 = vld [vmem:[%s424_s2] ss:$0 sm:$0xff] }
   0x5   :  { %298 = vmatprep.subr.bf16.mxu1 %v335_v0  ;;  %v327_v16 = vld [vmem:[%s425_s5] sm:$0xff]  }
   0x6   :  { %293 = vmatmul.mubr.msk.bf16.vlgmr.msra.gmra.mrb[0].mxu0 %vm44_vm1, %v28_v3  ;;  %v266_v20 = vld [vmem:[%s426_s4] ss:$0 sm:$0xff] }
   0x7   :  { %316 = vmatprep.mubr.msk.bf16.mxu0 %vm336_vm0, %v335_v0  ;;  %309 = vmatpush3.bf16.msra.mxu0 %v327_v16  ;;  %v272_v28 = vld [vmem:[%s427_s6] ss:$0 sm:$0xff] }
   0x8   :  { %299 = vmatpush3.bf16.msra.mxu1 %v324_v5  ;;  %310 = vmatprep.subr.bf16.mxu0 %v335_v0 }
   0x9   :  { %300 = vmatprep.subr.bf16.mxu1 %v335_v0 }
   0xb   :  { %311 = vmatpush3.bf16.msra.mxu0 %v328_v17 }
   0xc   :  { %301 = vmatpush3.bf16.msra.mxu1 %v325_v6  ;;  %312 = vmatprep.subr.bf16.mxu0 %v335_v0 }
   0xd   :  { %302 = vmatprep.subr.bf16.mxu1 %v335_v0 }
   0xf   :  { %313 = vmatpush3.bf16.msra.mxu0 %v329_v18 }
  0x10   :  { %303 = vmatpush3.bf16.msra.mxu1 %v326_v7  ;;  %314 = vmatprep.subr.bf16.mxu0 %v335_v0 }
  0x13   :  { %315 = vmatpush3.bf16.msra.mxu0 %v330_v19 }
  0xd9   :  { %v82_v9 = vpop.f32.mrb[0].mxu0 }
  0xda   :  { %v83_v10 = vadd.f32 %v263_v8, %v82_v9  ;;  %v294_v11 = vpop.f32.mrb[1].mxu0 }
  0xdb   :  { %v85_v12 = vpop.f32.mrb[2].mxu0 }
  0xdc   :  { %331 = vtanh.f32 %v83_v10  ;;  %v295_v13 = vpop.f32.mrb[3].mxu0 }
  0xe6   :  { %v332_v14 = vpop.eup %331 }
  0xe7   :  { %v89_v15 = vpack.c.bf16 %v332_v14, %v332_v14 }
  0xe9   :  { %305 = vmatmul.mubr.msk.bf16.vlgmr.msra.gmra.mrb[0].mxu1 %vm129_vm2, %v89_v15 }
 0x1bc   :  { %v167_v21 = vpop.f32.mrb[0].mxu1 }
 0x1bd   :  { %v168_v22 = vadd.f32 %v266_v20, %v167_v21  ;;  %v306_v23 = vpop.f32.mrb[1].mxu1 }
 0x1be   :  { %v170_v24 = vpop.f32.mrb[2].mxu1 }
 0x1bf   :  { %333 = vtanh.f32 %v168_v22  ;;  %v307_v25 = vpop.f32.mrb[3].mxu1 }
 0x1c9   :  { %v334_v26 = vpop.eup %333 }
 0x1ca   :  { %v174_v27 = vpack.c.bf16 %v334_v26, %v334_v26 }
 0x1cc   :  { %317 = vmatmul.mubr.msk.bf16.vlgmr.msra.gmra.mrb[4].mxu0 %vm129_vm2, %v174_v27 }
 0x29f   :  { %v251_v29 = vpop.f32.mrb[4].mxu0 }
 0x2a0   :  { %v252_v30 = vadd.f32 %v272_v28, %v251_v29  ;;  %v318_v31 = vpop.f32.mrb[5].mxu0 }
 0x2a1   :  { %v254_v32 = vpop.f32.mrb[6].mxu0 }
 0x2a2   :  { %258 = vst.msk [vmem:[%s428_s7] sm:$0xff] %vm257_vm3, %v252_v30  ;;  %v319_v33 = vpop.f32.mrb[7].mxu0 }

</bundles_post_ra>
